<compile_context>
chip_gen: v7x
topology: tpu7x:2x2x1
jax: 0.10.0
libtpu: 0.0.40
codegen_flags: <defaults>
</compile_context>

<pallas_src>
import functools

import jax
import jax.numpy as jnp
from jax.experimental import pallas as pl
from jax.experimental.pallas import tpu as pltpu


# ----------------------------------------------------------------------------
# __init__ glue: build the constant `pix` buffer exactly as the module does.
# ----------------------------------------------------------------------------
def make_pix(height, width, IK, rdistor=None, tdistor=None):
    H, W = height, width
    v, u = jnp.meshgrid(jnp.linspace(0.0, 1.0, H, dtype=jnp.float32),
                        jnp.linspace(0.0, 1.0, W, dtype=jnp.float32),
                        indexing="ij")
    i = jnp.ones_like(u)
    uv = jnp.stack([u, v, i], axis=-1).reshape(H, W, 3, 1)          # [H,W,3,1]
    f = jnp.array([1.0 - 1.0 / W, 1.0 - 1.0 / H, 1.0],
                  dtype=jnp.float32).reshape(1, 1, 3)
    IK = IK.reshape(4, 4).astype(jnp.float32)
    pix = jnp.einsum("ij,hwjk->hwik", IK[:3, :3], uv).reshape(H, W, 3)
    pix = pix * f

    x, y = pix[:, :, 0:1], pix[:, :, 1:2]
    r2 = x * x + y * y
    kr = 1.0
    if rdistor is not None:
        k1, k2, k3 = rdistor
        r4 = r2 * r2
        r6 = r4 * r2
        kr = kr + k1 * r2 + k2 * r4 + k3 * r6
    kdx, kdy = 0.0, 0.0
    if tdistor is not None:
        p1, p2 = tdistor
        kdx = 2.0 * p1 * x * y + p2 * (r2 + 2.0 * x * x)
        kdy = p1 * (r2 + 2.0 * y * y) + 2.0 * p2 * x * y
    pix = jnp.concatenate([x * kr + kdx, y * kr + kdy, pix[:, :, 2:3]], axis=-1)
    return pix                                                      # [H,W,3]


# ----------------------------------------------------------------------------
# Pallas kernel:
#   out[row, c*HWp + s] = depth[row, s] * pix[c, s]   for c in {0,1,2}
#   out[row, 3*HWp + s] = 1.0                         (only when use_mono)
# ----------------------------------------------------------------------------
def _backproj_kernel(depth_ref, pix_ref, out_ref, *, hw, use_mono):
    d = depth_ref[...]                       # (TM, HWp)  depth rows
    p = pix_ref[...]                         # (3,  HWp)  backprojection rays
    # Three straight VPU multiplies; each store is a lane-dense slab at a
    # static, vreg-aligned lane offset (HWp is a multiple of 128).
    out_ref[:, 0 * hw:1 * hw] = (d * p[0:1, :]).astype(out_ref.dtype)
    out_ref[:, 1 * hw:2 * hw] = (d * p[1:2, :]).astype(out_ref.dtype)
    out_ref[:, 2 * hw:3 * hw] = (d * p[2:3, :]).astype(out_ref.dtype)
    if use_mono:
        out_ref[:, 3 * hw:4 * hw] = jnp.ones_like(d).astype(out_ref.dtype)


def _vmem_capacity_bytes():
    """Generation-aware physical VMEM capacity (v7x: 64 MiB, v5e/v6e: 128 MiB)."""
    try:
        return int(pltpu.get_tpu_info().vmem_capacity_bytes)
    except Exception:
        return 128 << 20


def _choose_tm(bn, hw_pad, dtype, c_out, vmem_cap):
    """Pick the row tile TM.

    Live bytes per step ~= (1 input + c_out output) * TM * HWp * itemsize;
    the pipeline double-buffers that.  Budget ~ vmem_cap/5 keeps the pipelined
    footprint under vmem_cap/2 on every generation.  TM is snapped to the
    packed-sublane multiple of the dtype, prefers an exact divisor of BN
    (no ragged tail block), and keeps the grid >= 2 steps where possible so
    v7x's second TensorCore gets work.
    """
    itemsize = jnp.dtype(dtype).itemsize
    sub = max(8, 32 // itemsize)                      # 8 f32, 16 bf16, 32 int8
    bytes_per_row = (1 + c_out) * hw_pad * itemsize

    budget = max(vmem_cap // 5, bytes_per_row * sub)  # live-tile byte budget
    tm_cap = max(sub, (budget // bytes_per_row) // sub * sub)

    if bn <= sub:
        return bn                                     # full extent: always legal

    # Keep at least two grid steps (v7x megacore sharding of the parallel axis).
    half = max(sub, ((bn + 1) // 2) // sub * sub)
    tm_cap = min(tm_cap, half)

    # Prefer a TM that divides BN exactly (no ragged, masked tail block) while
    # staying within 2x of the bandwidth-optimal cap.
    lo = max(sub, tm_cap // 2)
    for tm in range(tm_cap, lo - 1, -sub):
        if bn % tm == 0:
            return tm
    return tm_cap


@functools.partial(jax.jit, static_argnames=("use_mono", "dim", "ret_scaled_depth"))
def depth_backproj_forward(depth, pix, use_mono=True, dim=-3,
                           ret_scaled_depth=False):
    """depth: [B,N,H,W], pix: [H,W,3] (from make_pix)."""
    assert depth.ndim == 4, depth.shape
    B, N, H, W = depth.shape
    # TODO(synk): bilinear F.interpolate path when depth spatial != (H, W)
    # is not implemented; inputs must already be at the calibrated (H, W).
    assert pix.shape == (H, W, 3), (pix.shape, (H, W, 3))

    HW = H * W
    HW_pad = ((HW + 127) // 128) * 128          # lane-dense channel slabs
    BN = B * N
    C = 4 if use_mono else 3
    itemsize = jnp.dtype(depth.dtype).itemsize

    depth_flat = depth.reshape(BN, HW)                               # (B*N, HW)
    pix_flat = jnp.transpose(pix, (2, 0, 1)).reshape(3, HW)          # (3,   HW)
    pix_flat = pix_flat.astype(depth.dtype)                          # no promote

    if HW_pad != HW:
        depth_flat = jnp.pad(depth_flat, ((0, 0), (0, HW_pad - HW)))
        pix_flat = jnp.pad(pix_flat, ((0, 0), (0, HW_pad - HW)))

    vmem_cap = _vmem_capacity_bytes()
    tm = _choose_tm(BN, HW_pad, depth.dtype, C, vmem_cap)
    grid = (pl.cdiv(BN, tm),)

    # Pipelined footprint (double-buffered in+out tiles) + slack for pix and
    # internal scratch; never request more than half of physical VMEM.
    pipelined = 2 * (1 + C) * tm * HW_pad * itemsize + (2 << 20)
    vmem_limit = int(min(max(pipelined, 32 << 20), vmem_cap // 2))

    out = pl.pallas_call(
        functools.partial(_backproj_kernel, hw=HW_pad, use_mono=use_mono),
        out_shape=jax.ShapeDtypeStruct((BN, C * HW_pad), depth.dtype),
        grid=grid,
        in_specs=[
            pl.BlockSpec((tm, HW_pad), lambda i: (i, 0)),
            pl.BlockSpec((3, HW_pad), lambda i: (0, 0)),   # VMEM-resident constant
        ],
        out_specs=pl.BlockSpec((tm, C * HW_pad), lambda i: (i, 0)),
        compiler_params=pltpu.CompilerParams(
            dimension_semantics=("parallel",),
            vmem_limit_bytes=vmem_limit),
        cost_estimate=pl.CostEstimate(
            flops=3 * BN * HW_pad,
            transcendentals=0,
            bytes_accessed=(1 + C) * BN * HW_pad * itemsize),
    )(depth_flat, pix_flat)

    if HW_pad == HW:
        pc = out.reshape(B, N, C, H, W)          # free: same row-major memory
    else:
        pc = out.reshape(B, N, C, HW_pad)[..., :HW].reshape(B, N, C, H, W)

    if dim not in (-3, 2):
        # Reference keeps channel-last layout in this case.
        # TODO(synk): if this path is hot, emit channel-last directly from a
        # variant kernel instead of paying an extra HBM pass for the transpose.
        pc = jnp.transpose(pc, (0, 1, 3, 4, 2))
    if ret_scaled_depth:
        return pc, depth
    return pc


# ----------------------------------------------------------------------------
# Plain-JAX reference (mirrors the PyTorch forward) for verification.
# ----------------------------------------------------------------------------
def reference_forward(depth, pix, use_mono=True, dim=-3):
    depth = depth.astype(jnp.float32)
    pc = depth[..., None] * pix[None, None]             # [B,N,H,W,3]
    if use_mono:
        ones = jnp.ones_like(depth)[..., None]
        pc = jnp.concatenate([pc, ones], axis=-1)
    if dim in (-3, 2):
        pc = jnp.transpose(pc, (0, 1, 4, 2, 3))
    return pc


if __name__ == "__main__":
    # Deterministic synthetic inverse-intrinsics matrix (normalized coords).
    fx, fy, cx, cy = 0.8, 0.9, 0.5, 0.5
    IK = jnp.array([[1.0 / fx, 0.0, -cx / fx, 0.0],
                    [0.0, 1.0 / fy, -cy / fy, 0.0],
                    [0.0, 0.0, 1.0, 0.0],
                    [0.0, 0.0, 0.0, 1.0]], dtype=jnp.float32)
    rdistor = [0.01, 0.001, 0.0001]
    tdistor = [0.001, 0.002]

    key = jax.random.PRNGKey(0)
    k1, k2, k3 = jax.random.split(key, 3)

    # --- Case 1: default path (HW % 128 == 0), f32 --------------------------
    B, N, H, W = 2, 4, 16, 16
    pix = make_pix(H, W, IK, rdistor, tdistor)
    depth = jax.random.uniform(k1, (B, N, H, W), jnp.float32, 0.1, 10.0)

    pc = jax.block_until_ready(depth_backproj_forward(depth, pix,
                                                      use_mono=True, dim=-3))
    ref = reference_forward(depth, pix, use_mono=True, dim=-3)
    assert pc.shape == (B, N, 4, H, W), pc.shape
    assert jnp.allclose(pc, ref, atol=1e-5, rtol=1e-5)

    pc3 = jax.block_until_ready(depth_backproj_forward(depth, pix,
                                                       use_mono=False, dim=-3))
    ref3 = reference_forward(depth, pix, use_mono=False, dim=-3)
    assert pc3.shape == (B, N, 3, H, W), pc3.shape
    assert jnp.allclose(pc3, ref3, atol=1e-5, rtol=1e-5)

    # channel-last + ret_scaled_depth path
    pc_cl, d_ret = depth_backproj_forward(depth, pix, use_mono=True, dim=-1,
                                          ret_scaled_depth=True)
    pc_cl = jax.block_until_ready(pc_cl)
    ref_cl = reference_forward(depth, pix, use_mono=True, dim=-1)
    assert pc_cl.shape == (B, N, H, W, 4), pc_cl.shape
    assert jnp.allclose(pc_cl, ref_cl, atol=1e-5, rtol=1e-5)
    assert jnp.array_equal(d_ret, depth)

    # --- Case 2: ragged grid rows and HW not a multiple of 128 --------------
    B2, N2, H2, W2 = 3, 5, 12, 10            # BN=15, HW=120 -> padded to 128
    pix2 = make_pix(H2, W2, IK, rdistor, tdistor)
    depth2 = jax.random.uniform(k2, (B2, N2, H2, W2), jnp.float32, 0.1, 10.0)
    pc2 = jax.block_until_ready(depth_backproj_forward(depth2, pix2,
                                                       use_mono=True, dim=-3))
    ref2 = reference_forward(depth2, pix2, use_mono=True, dim=-3)
    assert pc2.shape == (B2, N2, 4, H2, W2), pc2.shape
    assert jnp.allclose(pc2, ref2, atol=1e-5, rtol=1e-5)

    # --- Case 3: bf16 depth (kernel stays bf16 end-to-end) ------------------
    B3, N3, H3, W3 = 2, 8, 16, 16
    pix3 = make_pix(H3, W3, IK, rdistor, tdistor)
    depth3 = jax.random.uniform(k3, (B3, N3, H3, W3), jnp.float32,
                                0.1, 10.0).astype(jnp.bfloat16)
    pc_bf = jax.block_until_ready(depth_backproj_forward(depth3, pix3,
                                                         use_mono=True, dim=-3))
    ref_bf = reference_forward(depth3, pix3, use_mono=True, dim=-3)
    assert pc_bf.dtype == jnp.bfloat16, pc_bf.dtype
    assert pc_bf.shape == (B3, N3, 4, H3, W3), pc_bf.shape
    assert jnp.allclose(pc_bf.astype(jnp.float32), ref_bf, atol=5e-2, rtol=2e-2)

    print("KERNEL_OK")
</pallas_src>

<mosaic_0001>
module attributes {stable_mosaic.version = 11 : i64} {
  func.func @_backproj_kernel(%arg0: i32, %arg1: memref<8x256xf32, #tpu.memory_space<vmem>>, %arg2: memref<3x256xf32, #tpu.memory_space<vmem>>, %arg3: memref<8x1024xf32, #tpu.memory_space<vmem>>) attributes {dimension_semantics = [#tpu.dimension_semantics<parallel>], iteration_bounds = array<i64: 1>, scalar_prefetch = 0 : i64, scratch_operands = 0 : i64, tpu.core_type = #tpu.core_type<tc>, window_params = [{transform_indices = @transform_0, window_bounds = array<i64: 8, 256>}, {pipeline_mode = #tpu.pipeline_mode<synchronous>, transform_indices = @transform_1, window_bounds = array<i64: 3, 256>}, {transform_indices = @transform_2, window_bounds = array<i64: 8, 1024>}]} {
    %c0 = arith.constant 0 : index
    %c0_0 = arith.constant 0 : index
    %0 = vector.load %arg1[%c0, %c0_0] : memref<8x256xf32, #tpu.memory_space<vmem>>, vector<8x256xf32>
    %c0_1 = arith.constant 0 : index
    %c0_2 = arith.constant 0 : index
    %1 = vector.load %arg2[%c0_1, %c0_2] : memref<3x256xf32, #tpu.memory_space<vmem>>, vector<3x256xf32>
    %2 = vector.extract_strided_slice %1 {offsets = [0, 0], sizes = [1, 256], strides = [1, 1]} : vector<3x256xf32> to vector<1x256xf32>
    %3 = vector.broadcast %2 : vector<1x256xf32> to vector<8x256xf32>
    %4 = arith.mulf %0, %3 : vector<8x256xf32>
    %c0_3 = arith.constant 0 : index
    %c0_4 = arith.constant 0 : index
    %5 = vector.load %arg3[%c0_3, %c0_4] : memref<8x1024xf32, #tpu.memory_space<vmem>>, vector<8x256xf32>
    tpu.vector_store %arg3[%c0_3, %c0_4], %4 {strides = array<i32>} : memref<8x1024xf32, #tpu.memory_space<vmem>>, vector<8x256xf32>,
    %6 = vector.extract_strided_slice %1 {offsets = [1, 0], sizes = [1, 256], strides = [1, 1]} : vector<3x256xf32> to vector<1x256xf32>
    %7 = vector.broadcast %6 : vector<1x256xf32> to vector<8x256xf32>
    %8 = arith.mulf %0, %7 : vector<8x256xf32>
    %c0_5 = arith.constant 0 : index
    %c256 = arith.constant 256 : index
    %9 = vector.load %arg3[%c0_5, %c256] : memref<8x1024xf32, #tpu.memory_space<vmem>>, vector<8x256xf32>
    tpu.vector_store %arg3[%c0_5, %c256], %8 {strides = array<i32>} : memref<8x1024xf32, #tpu.memory_space<vmem>>, vector<8x256xf32>,
    %10 = vector.extract_strided_slice %1 {offsets = [2, 0], sizes = [1, 256], strides = [1, 1]} : vector<3x256xf32> to vector<1x256xf32>
    %11 = vector.broadcast %10 : vector<1x256xf32> to vector<8x256xf32>
    %12 = arith.mulf %0, %11 : vector<8x256xf32>
    %c0_6 = arith.constant 0 : index
    %c512 = arith.constant 512 : index
    %13 = vector.load %arg3[%c0_6, %c512] : memref<8x1024xf32, #tpu.memory_space<vmem>>, vector<8x256xf32>
    tpu.vector_store %arg3[%c0_6, %c512], %12 {strides = array<i32>} : memref<8x1024xf32, #tpu.memory_space<vmem>>, vector<8x256xf32>,
    %cst = arith.constant 1.000000e+00 : f32
    %14 = vector.broadcast %cst : f32 to vector<8x256xf32>
    %c0_7 = arith.constant 0 : index
    %c768 = arith.constant 768 : index
    %15 = vector.load %arg3[%c0_7, %c768] : memref<8x1024xf32, #tpu.memory_space<vmem>>, vector<8x256xf32>
    tpu.vector_store %arg3[%c0_7, %c768], %14 {strides = array<i32>} : memref<8x1024xf32, #tpu.memory_space<vmem>>, vector<8x256xf32>,
    return
  }
  func.func @transform_0(%arg0: i32) -> (i32, i32) {
    %c0_i32 = arith.constant 0 : i32
    %c0_i32_0 = arith.constant 0 : i32
    return %arg0, %c0_i32 : i32, i32
  }
  func.func @transform_1(%arg0: i32) -> (i32, i32) {
    %c0_i32 = arith.constant 0 : i32
    %c0_i32_0 = arith.constant 0 : i32
    %c0_i32_1 = arith.constant 0 : i32
    return %c0_i32, %c0_i32_0 : i32, i32
  }
  func.func @transform_2(%arg0: i32) -> (i32, i32) {
    %c0_i32 = arith.constant 0 : i32
    %c0_i32_0 = arith.constant 0 : i32
    return %arg0, %c0_i32 : i32, i32
  }
}

</mosaic_0001>

<bundles_post_ra>
// kernel: depth_backproj_forward.1
= control target key start
LH: loop header
LB: loop body
LE: loop exit
PB: predicated region body
PF: predicated region fallthrough
CT: control target
= control target key end

     0   :  { %v15_v0 = vlaneseq  ;;  %v88_v1 = vmov 1.0   ;;  %s137_s1 = inlined_call_operand.vmem [shape: f32[3,256], index: 1, kind: input, shape index: {}]   ;;  %s138_s2 = inlined_call_operand.vmem [shape: f32[8,1024], index: 2, kind: output, shape index: {}]   ;;  %s139_s0 = inlined_call_operand.vmem [shape: f32[8,256], index: 0, kind: input, shape index: {}]  }
   0x1   :  { %81 = vst [vmem:[%s138_s2 + $0x30] sm:$0xff] %v88_v1  ;;  %82 = vst [vmem:[%s138_s2 + $0x38] sm:$0xff] %v88_v1  ;;  %v13_v3 = vld [vmem:[%s137_s1] sm:$0x77]  ;;  %v12_v15 = vld [vmem:[%s139_s0 + $0x8] sm:$0xff] }
   0x2   :  { %v16_v2 = vshrl.u32 %v15_v0, 7  ;;  %v11_v14 = vld [vmem:[%s139_s0] sm:$0xff] }
   0x4   :  { %v17_v4 = vsub.s32 0, %v16_v2  ;;  %v21_v5 = vsub.s32 4, %v16_v2  ;;  %v39_v6 = vsub.s32 1, %v16_v2  ;;  %v43_v7 = vsub.s32 5, %v16_v2 }
   0x5   :  { %v61_v8 = vsub.s32 2, %v16_v2  ;;  %v65_v9 = vsub.s32 6, %v16_v2 }
   0x6   :  { %v18_v10 = vrot.slane %v13_v3, %v17_v4  ;;  %v22_v11 = vrot.slane %v13_v3, %v21_v5  ;;  %v40_v12 = vrot.slane %v13_v3, %v39_v6  ;;  %v44_v13 = vrot.slane %v13_v3, %v43_v7 }
   0x7   :  { %v62_v16 = vrot.slane %v13_v3, %v61_v8  ;;  %v66_v17 = vrot.slane %v13_v3, %v65_v9 }
   0x8   :  { %v28_v18 = vrot.slane %v18_v10, %v17_v4  ;;  %v32_v19 = vrot.slane %v22_v11, %v17_v4  ;;  %v50_v20 = vrot.slane %v40_v12, %v39_v6  ;;  %v54_v21 = vrot.slane %v44_v13, %v39_v6 }
   0x9   :  { %v72_v22 = vrot.slane %v62_v16, %v61_v8  ;;  %v76_v23 = vrot.slane %v66_v17, %v61_v8 }
   0xa   :  { %v33_v24 = vmul.f32 %v28_v18, %v11_v14  ;;  %v34_v25 = vmul.f32 %v32_v19, %v12_v15  ;;  %v55_v26 = vmul.f32 %v50_v20, %v11_v14  ;;  %v56_v27 = vmul.f32 %v54_v21, %v12_v15 }
   0xb   :  { %v77_v28 = vmul.f32 %v72_v22, %v11_v14  ;;  %v78_v29 = vmul.f32 %v76_v23, %v12_v15 }
   0xc   :  { %35 = vst [vmem:[%s138_s2] sm:$0xff] %v33_v24  ;;  %36 = vst [vmem:[%s138_s2 + $0x8] sm:$0xff] %v34_v25 }
   0xd   :  { %57 = vst [vmem:[%s138_s2 + $0x10] sm:$0xff] %v55_v26  ;;  %58 = vst [vmem:[%s138_s2 + $0x18] sm:$0xff] %v56_v27 }
   0xe   :  { %79 = vst [vmem:[%s138_s2 + $0x20] sm:$0xff] %v77_v28  ;;  %80 = vst [vmem:[%s138_s2 + $0x28] sm:$0xff] %v78_v29 }

</bundles_post_ra>
